<compile_context>
chip_gen: v6e
topology: v6e:2x2x1
jax: 0.10.0
libtpu: 0.0.40
codegen_flags: <defaults>
</compile_context>

<pallas_src>
import functools
import math

import jax
import jax.numpy as jnp
from jax.experimental import pallas as pl
from jax.experimental.pallas import tpu as pltpu


# ---------------------------------------------------------------------------
# Fused Pallas kernel: all GCN layers + readout in one invocation
# ---------------------------------------------------------------------------

def ckd_fused_kernel(*refs, num_layers, bn, alphas, use_bf16_mxu):
    """Fused CKDmodel forward.

    refs layout (all VMEM):
      refs[0]          : seq_flat (B*N, F_in)
      refs[1]          : agg      (B*N + B, B*N)  block-diag adj + averaging rows
      refs[2 + 2*l]    : W_l^T    (F_in_l, F_out_l)   pre-transposed
      refs[3 + 2*l]    : b_l      (1, F_out_l)
      refs[-2]         : node-embedding output (B*N, F_out)
      refs[-1]         : graph-embedding output (B, F_out)
    """
    seq_ref, agg_ref = refs[0], refs[1]
    out_node_ref, out_graph_ref = refs[-2], refs[-1]

    mxu_dtype = jnp.bfloat16 if use_bf16_mxu else jnp.float32

    agg = agg_ref[...]                 # (B*N + B, B*N) f32, loaded once
    adj_bd = agg[:bn, :]               # block-diagonal part for intermediate layers

    x = seq_ref[...].astype(jnp.float32)                      # (B*N, F_in)

    for l in range(num_layers):
        w = refs[2 + 2 * l][...]                               # (F_in_l, F_out_l)
        b = refs[3 + 2 * l][...]                               # (1, F_out_l)

        # Linear over all B*N node rows at once (single MXU pass, f32 accumulate).
        fts = jnp.dot(x.astype(mxu_dtype), w.astype(mxu_dtype),
                      preferred_element_type=jnp.float32)      # (B*N, F_out)

        if l != num_layers - 1:
            # Block-diagonal adjacency aggregation: one MXU push for the whole batch.
            h = jnp.dot(adj_bd.astype(mxu_dtype), fts.astype(mxu_dtype),
                        preferred_element_type=jnp.float32) + b
            a = alphas[l]                                      # compile-time constant
            x = jnp.where(h > 0, h, a * h)                     # PReLU (shared slope)
        else:
            # Last layer: extended aggregation produces node rows AND the per-batch
            # node means (pre-sigmoid graph embedding) in one matmul.
            full = jnp.dot(agg.astype(mxu_dtype), fts.astype(mxu_dtype),
                           preferred_element_type=jnp.float32) + b   # (B*N + B, F_out)
            out_node_ref[...] = full[:bn, :].astype(out_node_ref.dtype)
            out_graph_ref[...] = jax.nn.sigmoid(full[bn:, :]).astype(out_graph_ref.dtype)


# ---------------------------------------------------------------------------
# Wrapper
# ---------------------------------------------------------------------------

def ckdmodel_forward(seq, adj, params, *, use_bf16_mxu=False):
    """params: list of dicts per layer with keys 'wt' (Fin,Fout), 'b' (1,Fout), 'alpha'."""
    B, N, Fin = seq.shape
    L = len(params)
    Fout = params[-1]["wt"].shape[1]
    bn = B * N
    alphas = tuple(float(p["alpha"]) for p in params)

    seq_flat = seq.reshape(bn, Fin)                      # free reshape outside kernel

    # --- Extended block-diagonal aggregation matrix (built once per call, tiny) ----
    eye_b = jnp.eye(B, dtype=jnp.float32)                                  # (B, B)
    adj_bd = jnp.einsum("bc,bnm->bncm", eye_b, adj).reshape(bn, bn)        # block_diag
    colsum = jnp.sum(adj, axis=1) * jnp.float32(1.0 / N)                   # (B, N)
    avg_rows = jnp.einsum("bc,bm->bcm", eye_b, colsum).reshape(B, bn)      # (B, B*N)
    agg = jnp.concatenate([adj_bd, avg_rows], axis=0)                      # (B*N+B, B*N)

    # --- Specs -----------------------------------------------------------------
    in_specs = [
        pl.BlockSpec((bn, Fin), lambda i: (0, 0)),
        pl.BlockSpec((bn + B, bn), lambda i: (0, 0)),
    ]
    layer_args = []
    for p in params:
        wt, b2 = p["wt"], p["b"]                          # already (Fin,Fout) / (1,Fout)
        layer_args += [wt, b2]
        in_specs += [
            pl.BlockSpec(wt.shape, lambda i: (0, 0)),
            pl.BlockSpec(b2.shape, lambda i: (0, 0)),
        ]

    # --- Cost estimate (helps XLA schedule around the custom call) --------------
    flops = 0
    for p in params:
        fin_l, fout_l = p["wt"].shape
        flops += 2 * bn * fin_l * fout_l          # linear transform
        flops += 2 * bn * bn * fout_l             # block-diag aggregation
    flops += 2 * B * bn * Fout                    # averaging rows (last layer only)
    bytes_accessed = 4 * (seq_flat.size + agg.size
                          + sum(p["wt"].size + p["b"].size for p in params)
                          + bn * Fout + B * Fout)
    cost = pl.CostEstimate(flops=int(flops),
                           transcendentals=int(B * Fout),
                           bytes_accessed=int(bytes_accessed))

    kernel = functools.partial(
        ckd_fused_kernel, num_layers=L, bn=bn, alphas=alphas,
        use_bf16_mxu=use_bf16_mxu)

    node_flat, graph_emb = pl.pallas_call(
        kernel,
        out_shape=(
            jax.ShapeDtypeStruct((bn, Fout), jnp.float32),
            jax.ShapeDtypeStruct((B, Fout), jnp.float32),
        ),
        grid=(1,),                                # whole problem = one grid step
        in_specs=in_specs,
        out_specs=(
            pl.BlockSpec((bn, Fout), lambda i: (0, 0)),
            pl.BlockSpec((B, Fout), lambda i: (0, 0)),
        ),
        compiler_params=pltpu.CompilerParams(
            dimension_semantics=("arbitrary",)),
        cost_estimate=cost,
    )(seq_flat, agg, *layer_args)

    return node_flat.reshape(B, N, Fout), graph_emb


# ---------------------------------------------------------------------------
# Deterministic parameter init (mirrors the torch __init__ shapes).
# Weights are stored pre-transposed (Fin, Fout) so the forward wrapper does no
# per-call transpose/reshape work.
# ---------------------------------------------------------------------------

def xavier_uniform(key, fan_out, fan_in):
    bound = math.sqrt(6.0 / (fan_in + fan_out))
    return jax.random.uniform(key, (fan_out, fan_in), jnp.float32,
                              minval=-bound, maxval=bound)


def init_ckd_params(key, in_ft, out_ft, layers):
    dim = [in_ft] + [out_ft] * layers
    params = []
    for layer in range(layers):
        key, wk = jax.random.split(key)
        w = xavier_uniform(wk, dim[layer + 1], dim[layer])   # torch Linear weight (out, in)
        params.append(dict(
            w=w,                                             # original layout (for reference)
            wt=jnp.asarray(w.T),                             # pre-transposed (in, out) for MXU
            b=jnp.zeros((1, dim[layer + 1]), jnp.float32),   # GCN bias, filled with 0
            alpha=0.25,                                      # PReLU default init
            apply_act=(layer != layers - 1),                 # last layer has act=None
        ))
    # node_trans / graph_trans are defined in torch __init__ but never used in
    # forward; intentionally omitted here.
    return params


# ---------------------------------------------------------------------------
# Main
# ---------------------------------------------------------------------------

if __name__ == "__main__":
    B, N = 2, 16
    in_ft, out_ft, layers = 32, 32, 2

    key = jax.random.PRNGKey(0)
    k_seq, k_adj, k_par = jax.random.split(key, 3)

    seq = jax.random.normal(k_seq, (B, N, in_ft), jnp.float32)
    # Dense row-normalized random adjacency.
    adj_raw = jax.random.uniform(k_adj, (B, N, N), jnp.float32)
    adj = adj_raw / jnp.sum(adj_raw, axis=-1, keepdims=True)

    params = init_ckd_params(k_par, in_ft, out_ft, layers)

    out, graph_emb = ckdmodel_forward(seq, adj, params)
    jax.block_until_ready((out, graph_emb))

    assert out.shape == (B, N, out_ft)
    assert graph_emb.shape == (B, out_ft)

    # Pure-JAX reference check (mirrors the torch forward exactly).
    ref = seq
    for p in params:
        fts = jnp.einsum("bnf,of->bno", ref, p["w"])
        r = jnp.einsum("bnm,bmo->bno", adj, fts) + p["b"]
        if p["apply_act"]:
            r = jnp.where(r > 0, r, p["alpha"] * r)
        ref = r
    ref_graph = jax.nn.sigmoid(jnp.mean(ref, axis=1))
    assert jnp.allclose(out, ref, atol=1e-5), "node embedding mismatch"
    assert jnp.allclose(graph_emb, ref_graph, atol=1e-5), "graph embedding mismatch"

    print("KERNEL_OK")
</pallas_src>

<mosaic_0001>
module attributes {stable_mosaic.version = 11 : i64} {
  func.func @ckd_fused_kernel(%arg0: i32, %arg1: memref<32x32xf32, #tpu.memory_space<vmem>>, %arg2: memref<34x32xf32, #tpu.memory_space<vmem>>, %arg3: memref<32x32xf32, #tpu.memory_space<vmem>>, %arg4: memref<1x32xf32, #tpu.memory_space<vmem>>, %arg5: memref<32x32xf32, #tpu.memory_space<vmem>>, %arg6: memref<1x32xf32, #tpu.memory_space<vmem>>, %arg7: memref<32x32xf32, #tpu.memory_space<vmem>>, %arg8: memref<2x32xf32, #tpu.memory_space<vmem>>) attributes {dimension_semantics = [#tpu.dimension_semantics<arbitrary>], iteration_bounds = array<i64: 1>, scalar_prefetch = 0 : i64, scratch_operands = 0 : i64, tpu.core_type = #tpu.core_type<tc>, window_params = [{pipeline_mode = #tpu.pipeline_mode<synchronous>, transform_indices = @transform_0, window_bounds = array<i64: 32, 32>}, {pipeline_mode = #tpu.pipeline_mode<synchronous>, transform_indices = @transform_1, window_bounds = array<i64: 34, 32>}, {pipeline_mode = #tpu.pipeline_mode<synchronous>, transform_indices = @transform_2, window_bounds = array<i64: 32, 32>}, {pipeline_mode = #tpu.pipeline_mode<synchronous>, transform_indices = @transform_3, window_bounds = array<i64: 1, 32>}, {pipeline_mode = #tpu.pipeline_mode<synchronous>, transform_indices = @transform_4, window_bounds = array<i64: 32, 32>}, {pipeline_mode = #tpu.pipeline_mode<synchronous>, transform_indices = @transform_5, window_bounds = array<i64: 1, 32>}, {pipeline_mode = #tpu.pipeline_mode<synchronous>, transform_indices = @transform_6, window_bounds = array<i64: 32, 32>}, {pipeline_mode = #tpu.pipeline_mode<synchronous>, transform_indices = @transform_7, window_bounds = array<i64: 2, 32>}]} {
    %c0 = arith.constant 0 : index
    %c0_0 = arith.constant 0 : index
    %0 = vector.load %arg2[%c0, %c0_0] : memref<34x32xf32, #tpu.memory_space<vmem>>, vector<34x32xf32>
    %1 = vector.extract_strided_slice %0 {offsets = [0, 0], sizes = [32, 32], strides = [1, 1]} : vector<34x32xf32> to vector<32x32xf32>
    %c0_1 = arith.constant 0 : index
    %c0_2 = arith.constant 0 : index
    %2 = vector.load %arg1[%c0_1, %c0_2] : memref<32x32xf32, #tpu.memory_space<vmem>>, vector<32x32xf32>
    %c0_3 = arith.constant 0 : index
    %c0_4 = arith.constant 0 : index
    %3 = vector.load %arg3[%c0_3, %c0_4] : memref<32x32xf32, #tpu.memory_space<vmem>>, vector<32x32xf32>
    %c0_5 = arith.constant 0 : index
    %c0_6 = arith.constant 0 : index
    %4 = vector.load %arg4[%c0_5, %c0_6] : memref<1x32xf32, #tpu.memory_space<vmem>>, vector<1x32xf32>
    %cst = arith.constant dense<0.000000e+00> : vector<32x32xf32>
    %5 = tpu.matmul %2, %3, %cst {dimension_numbers = #tpu.dot_dimension_numbers<[1], [0], [0], [1], [0, 0, 1, 1], [], []>} : vector<32x32xf32>, vector<32x32xf32>, vector<32x32xf32> -> vector<32x32xf32>
    %cst_7 = arith.constant dense<0.000000e+00> : vector<32x32xf32>
    %6 = tpu.matmul %1, %5, %cst_7 {dimension_numbers = #tpu.dot_dimension_numbers<[1], [0], [0], [1], [0, 0, 1, 1], [], []>} : vector<32x32xf32>, vector<32x32xf32>, vector<32x32xf32> -> vector<32x32xf32>
    %7 = vector.broadcast %4 : vector<1x32xf32> to vector<32x32xf32>
    %8 = arith.addf %6, %7 : vector<32x32xf32>
    %cst_8 = arith.constant 0.000000e+00 : f32
    %9 = vector.broadcast %cst_8 : f32 to vector<32x32xf32>
    %10 = arith.cmpf ogt, %8, %9 : vector<32x32xf32>
    %cst_9 = arith.constant 2.500000e-01 : f32
    %11 = vector.broadcast %cst_9 : f32 to vector<32x32xf32>
    %12 = arith.mulf %11, %8 : vector<32x32xf32>
    %13 = arith.select %10, %8, %12 : vector<32x32xi1>, vector<32x32xf32>
    %c0_10 = arith.constant 0 : index
    %c0_11 = arith.constant 0 : index
    %14 = vector.load %arg5[%c0_10, %c0_11] : memref<32x32xf32, #tpu.memory_space<vmem>>, vector<32x32xf32>
    %c0_12 = arith.constant 0 : index
    %c0_13 = arith.constant 0 : index
    %15 = vector.load %arg6[%c0_12, %c0_13] : memref<1x32xf32, #tpu.memory_space<vmem>>, vector<1x32xf32>
    %cst_14 = arith.constant dense<0.000000e+00> : vector<32x32xf32>
    %16 = tpu.matmul %13, %14, %cst_14 {dimension_numbers = #tpu.dot_dimension_numbers<[1], [0], [0], [1], [0, 0, 1, 1], [], []>} : vector<32x32xf32>, vector<32x32xf32>, vector<32x32xf32> -> vector<32x32xf32>
    %cst_15 = arith.constant dense<0.000000e+00> : vector<34x32xf32>
    %17 = tpu.matmul %0, %16, %cst_15 {dimension_numbers = #tpu.dot_dimension_numbers<[1], [0], [0], [1], [0, 0, 1, 1], [], []>} : vector<34x32xf32>, vector<32x32xf32>, vector<34x32xf32> -> vector<34x32xf32>
    %18 = vector.broadcast %15 : vector<1x32xf32> to vector<34x32xf32>
    %19 = arith.addf %17, %18 : vector<34x32xf32>
    %20 = vector.extract_strided_slice %19 {offsets = [0, 0], sizes = [32, 32], strides = [1, 1]} : vector<34x32xf32> to vector<32x32xf32>
    %c0_16 = arith.constant 0 : index
    %c0_17 = arith.constant 0 : index
    %21 = vector.load %arg7[%c0_16, %c0_17] : memref<32x32xf32, #tpu.memory_space<vmem>>, vector<32x32xf32>
    tpu.vector_store %arg7[%c0_16, %c0_17], %20 {strides = array<i32>} : memref<32x32xf32, #tpu.memory_space<vmem>>, vector<32x32xf32>,
    %22 = vector.extract_strided_slice %19 {offsets = [32, 0], sizes = [2, 32], strides = [1, 1]} : vector<34x32xf32> to vector<2x32xf32>
    %23 = arith.negf %22 : vector<2x32xf32>
    %24 = math.exp %23 : vector<2x32xf32>
    %cst_18 = arith.constant 1.000000e+00 : f32
    %25 = vector.broadcast %cst_18 : f32 to vector<2x32xf32>
    %26 = arith.addf %25, %24 : vector<2x32xf32>
    %27 = arith.divf %25, %26 : vector<2x32xf32>
    %c0_19 = arith.constant 0 : index
    %c0_20 = arith.constant 0 : index
    %28 = vector.load %arg8[%c0_19, %c0_20] : memref<2x32xf32, #tpu.memory_space<vmem>>, vector<2x32xf32>
    tpu.vector_store %arg8[%c0_19, %c0_20], %27 {strides = array<i32>} : memref<2x32xf32, #tpu.memory_space<vmem>>, vector<2x32xf32>,
    return
  }
  func.func @transform_0(%arg0: i32) -> (i32, i32) {
    %c0_i32 = arith.constant 0 : i32
    %c0_i32_0 = arith.constant 0 : i32
    %c0_i32_1 = arith.constant 0 : i32
    return %c0_i32, %c0_i32_0 : i32, i32
  }
  func.func @transform_1(%arg0: i32) -> (i32, i32) {
    %c0_i32 = arith.constant 0 : i32
    %c0_i32_0 = arith.constant 0 : i32
    %c0_i32_1 = arith.constant 0 : i32
    return %c0_i32, %c0_i32_0 : i32, i32
  }
  func.func @transform_2(%arg0: i32) -> (i32, i32) {
    %c0_i32 = arith.constant 0 : i32
    %c0_i32_0 = arith.constant 0 : i32
    %c0_i32_1 = arith.constant 0 : i32
    return %c0_i32, %c0_i32_0 : i32, i32
  }
  func.func @transform_3(%arg0: i32) -> (i32, i32) {
    %c0_i32 = arith.constant 0 : i32
    %c0_i32_0 = arith.constant 0 : i32
    %c0_i32_1 = arith.constant 0 : i32
    return %c0_i32, %c0_i32_0 : i32, i32
  }
  func.func @transform_4(%arg0: i32) -> (i32, i32) {
    %c0_i32 = arith.constant 0 : i32
    %c0_i32_0 = arith.constant 0 : i32
    %c0_i32_1 = arith.constant 0 : i32
    return %c0_i32, %c0_i32_0 : i32, i32
  }
  func.func @transform_5(%arg0: i32) -> (i32, i32) {
    %c0_i32 = arith.constant 0 : i32
    %c0_i32_0 = arith.constant 0 : i32
    %c0_i32_1 = arith.constant 0 : i32
    return %c0_i32, %c0_i32_0 : i32, i32
  }
  func.func @transform_6(%arg0: i32) -> (i32, i32) {
    %c0_i32 = arith.constant 0 : i32
    %c0_i32_0 = arith.constant 0 : i32
    %c0_i32_1 = arith.constant 0 : i32
    return %c0_i32, %c0_i32_0 : i32, i32
  }
  func.func @transform_7(%arg0: i32) -> (i32, i32) {
    %c0_i32 = arith.constant 0 : i32
    %c0_i32_0 = arith.constant 0 : i32
    %c0_i32_1 = arith.constant 0 : i32
    return %c0_i32, %c0_i32_0 : i32, i32
  }
}

</mosaic_0001>

<bundles_post_ra>
// kernel: tpu_custom_call.1
= control target key start
LH: loop header
LB: loop body
LE: loop exit
PB: predicated region body
PF: predicated region fallthrough
CT: control target
= control target key end

     0   :  { %13 = vsyncpa [#allocation3], 0  ;;  %s844_s0 = inlined_call_operand.vmem [shape: f32[32,32], index: 0, kind: input, shape index: {}]   ;;  %s845_s1 = inlined_call_operand.vmem [shape: f32[34,32], index: 1, kind: input, shape index: {}]   ;;  %s846_s2 = inlined_call_operand.vmem [shape: f32[32,32], index: 2, kind: input, shape index: {}]   ;;  %s847_s3 = inlined_call_operand.vmem [shape: f32[1,32], index: 3, kind: input, shape index: {}]   ;;  %s848_s4 = inlined_call_operand.hbm [shape: f32[32,32], index: 4, kind: input, shape index: {}]   ;;  %s849_s5 = inlined_call_operand.vmem [shape: f32[1,32], index: 5, kind: input, shape index: {}]   ;;  %s850_s6 = inlined_call_operand.hbm [shape: f32[32,32], index: 6, kind: output, shape index: {0}]   ;;  %s851_s7 = inlined_call_operand.hbm [shape: f32[2,32], index: 7, kind: output, shape index: {1}]  }
   0x1   :  { %14 = vsyncpa [#allocation4], 0 }
   0x2   :  { %15 = vsyncpa [#allocation7], 0  ;;  %s707_s24 = smov [#allocation2]  }
   0x3   :  { %s29_s25 = sshll.u32 %s707_s24, 4  ;;  %s30_s25 = int_to_ptr.vmem [resolvable:$true] %s29_s25 }
   0x4   :  { %s649_s26 = scalar_lea.vmem %s30_s25, 512  ;;  %p654_p1 = scmp.lt.s32.totalorder %s30_s25, %s30_s25 }
   0x5   :  { %p650_p0 = scmp.ne.s32.totalorder %s30_s25, %s649_s26  ;;  %p655_p2 = scmp.lt.s32.totalorder %s649_s26, %s649_s26 }
   0x7   :  { %p656_p3 = por %p655_p2, %p654_p1 }
   0x9   :  { %p657_p4 = pnand %p656_p3, %p650_p0 }
   0xb   :  { %660 = shalt.err (!%p657_p4)
}
   0xc   :  { %s708_s27 = smov 128   ;;  %s709_s28 = smov 8  }
   0xd   :  { %35 = dma.hbm_to_vmem [thread:$0]  %s848_s4, 512, %s30_s25, [#allocation3], %s708_s27, %s708_s27, %s709_s28  }
   0xe   :  { %701 = dma.done.wait [#allocation3], 512  }
   0xf   :  { %702 = vsyncadd [#allocation3], 4294966784  ;;  %vm55_vm0 = vcmask 261120   ;;  %v53_v0 = vld [vmem:[%s846_s2 + $0x18] sm:$0xff]  ;;  %v52_v1 = vld [vmem:[%s846_s2 + $0x10] sm:$0xff]  ;;  %v710_v37 = vmov 0.0  }
  0x10   :  { %565 = vmatprep.subr.mxu0 %v53_v0  ;;  %v46_v2 = vld [vmem:[%s844_s0] sm:$0xff]  ;;  %v51_v3 = vld [vmem:[%s846_s2 + $0x8] sm:$0xff]  ;;  %v48_v6 = vld [vmem:[%s844_s0 + $0x10] sm:$0xff]  ;;  %607 = vmatprep.subr.mxu1 %v710_v37  ;;  %vm711_vm5 = vmmov 0  }
  0x11   :  { %566 = vmatpush3.msra.mxu0 %v53_v0  ;;  %573 = vmatprep.mubr.msk.f32.mxu0 %vm55_vm0, %v46_v2  ;;  %v50_v4 = vld [vmem:[%s846_s2] sm:$0xff]  ;;  %v47_v5 = vld [vmem:[%s844_s0 + $0x8] sm:$0xff]  ;;  %v49_v7 = vld [vmem:[%s844_s0 + $0x18] sm:$0xff] }
  0x12   :  { %567 = vmatprep.subr.mxu0 %v52_v1  ;;  %v791_v8 = vld [vmem:[%s845_s1] sm:$0xff]  ;;  %v42_v13 = vld [vmem:[%s845_s1 + $0x8] sm:$0xff]  ;;  %v43_v14 = vld [vmem:[%s845_s1 + $0x10] sm:$0xff]  ;;  %615 = vmatprep.mubr.msk.f32.mxu1 %vm711_vm5, %v710_v37 }
  0x13   :  { %568 = vmatpush3.msra.mxu0 %v52_v1  ;;  %v44_v15 = vld [vmem:[%s845_s1 + $0x18] sm:$0xff]  ;;  %v270_v17 = vld [vmem:[#allocation2 + $0x10] sm:$0xff]  ;;  %v269_v18 = vld [vmem:[#allocation2 + $0x8] sm:$0xff] }
  0x14   :  { %569 = vmatprep.subr.mxu0 %v51_v3  ;;  %v271_v16 = vld [vmem:[#allocation2 + $0x18] sm:$0xff]  ;;  %v268_v19 = vld [vmem:[#allocation2] sm:$0xff] }
  0x15   :  { %570 = vmatpush3.msra.mxu0 %v51_v3  ;;  %v516_v20 = vld [vmem:[%s847_s3] ss:$0 sm:$0xff] }
  0x16   :  { %571 = vmatprep.subr.mxu0 %v50_v4  ;;  %v45_v42 = vld [vmem:[%s845_s1 + $0x20] sm:$0x3]  ;;  %s712_s1 = smov [#allocation5]  }
  0x17   :  { %572 = vmatpush3.msra.mxu0 %v50_v4  ;;  %v525_v43 = vld [vmem:[%s849_s5] ss:$0 sm:$0xff]  ;;  %s486_s13 = sshll.u32 %s712_s1, 4  ;;  %s487_s13 = int_to_ptr.vmem [resolvable:$true] %s486_s13 }
  0x18   :  { %574 = vmatmul.mubr.msk.f32.vlgmr.msra.gmra.mxu0 %vm55_vm0, %v47_v5  ;;  %s661_s5 = scalar_lea.vmem %s487_s13, 512  ;;  %p666_p6 = scmp.lt.s32.totalorder %s487_s13, %s487_s13 }
  0x19   :  { %576 = vmatprep.mubr.msk.f32.mxu0 %vm55_vm0, %v48_v6  ;;  %p662_p5 = scmp.ne.s32.totalorder %s487_s13, %s661_s5  ;;  %p667_p7 = scmp.lt.s32.totalorder %s661_s5, %s661_s5 }
  0x1b   :  { %p668_p8 = por %p667_p7, %p666_p6 }
  0x1c   :  { %577 = vmatmul.mubr.msk.f32.gmra.mxu0 %vm55_vm0, %v49_v7 }
  0x1d   :  { %587 = vmatprep.mubr.msk.f32.mxu0 %vm55_vm0, %v791_v8  ;;  %p669_p9 = pnand %p668_p8, %p662_p5 }
  0xd8   :  { %v575_v9 = vpop.f32.mrf.mxu0 }
  0xda   :  { %v134_v10 = vpop.f32.mrf.mxu0 }
  0xdc   :  { %v578_v11 = vpop.f32.mrf.mxu0 }
  0xdd   :  { %579 = vmatprep.subr.mxu0 %v578_v11 }
  0xde   :  { %v144_v12 = vpop.f32.mrf.mxu0  ;;  %580 = vmatpush3.msra.mxu0 %v578_v11 }
  0xdf   :  { %581 = vmatprep.subr.mxu0 %v144_v12 }
  0xe0   :  { %582 = vmatpush3.msra.mxu0 %v144_v12 }
  0xe1   :  { %583 = vmatprep.subr.mxu0 %v575_v9 }
  0xe2   :  { %584 = vmatpush3.msra.mxu0 %v575_v9 }
  0xe3   :  { %585 = vmatprep.subr.mxu0 %v134_v10 }
  0xe4   :  { %586 = vmatpush3.msra.mxu0 %v134_v10 }
  0xe5   :  { %588 = vmatmul.mubr.msk.f32.vlgmr.msra.gmra.mxu0 %vm55_vm0, %v42_v13  ;;  %593 = vmatprep.subr.mxu0 %v271_v16 }
  0xe6   :  { %590 = vmatprep.mubr.msk.f32.mxu0 %vm55_vm0, %v43_v14  ;;  %594 = vmatpush3.msra.mxu0 %v271_v16 }
  0xe7   :  { %595 = vmatprep.subr.mxu0 %v270_v17 }
  0xe8   :  { %596 = vmatpush3.msra.mxu0 %v270_v17 }
  0xe9   :  { %591 = vmatmul.mubr.msk.f32.gmra.mxu0 %vm55_vm0, %v44_v15  ;;  %597 = vmatprep.subr.mxu0 %v269_v18 }
  0xea   :  { %598 = vmatpush3.msra.mxu0 %v269_v18 }
  0xeb   :  { %599 = vmatprep.subr.mxu0 %v268_v19 }
  0xec   :  { %600 = vmatpush3.msra.mxu0 %v268_v19 }
 0x1a5   :  { %v589_v21 = vpop.f32.mrf.mxu0 }
 0x1a6   :  { %v243_v22 = vadd.f32 %v589_v21, %v516_v20 }
 0x1a7   :  { %v237_v23 = vpop.f32.mrf.mxu0 }
 0x1a8   :  { %v238_v24 = vadd.f32 %v516_v20, %v237_v23  ;;  %v261_v25 = vmul.f32 0.25, %v243_v22  ;;  %vm257_vm1 = vcmp.gt.f32.partialorder %v243_v22, 0.0 }
 0x1a9   :  { %v592_v26 = vpop.f32.mrf.mxu0 }
 0x1aa   :  { %vm256_vm2 = vcmp.gt.f32.partialorder %v238_v24, 0.0  ;;  %v260_v27 = vmul.f32 0.25, %v238_v24  ;;  %v253_v28 = vadd.f32 %v592_v26, %v516_v20  ;;  %v265_v32 = vsel %vm257_vm1, %v243_v22, %v261_v25 }
 0x1ab   :  { %v247_v29 = vpop.f32.mrf.mxu0 }
 0x1ac   :  { %v248_v30 = vadd.f32 %v516_v20, %v247_v29  ;;  %v264_v31 = vsel %vm256_vm2, %v238_v24, %v260_v27  ;;  %v263_v33 = vmul.f32 0.25, %v253_v28  ;;  %vm259_vm3 = vcmp.gt.f32.partialorder %v253_v28, 0.0 }
 0x1ad   :  { %601 = vmatprep.mubr.msk.f32.mxu0 %vm55_vm0, %v264_v31 }
 0x1ae   :  { %vm258_vm4 = vcmp.gt.f32.partialorder %v248_v30, 0.0  ;;  %v262_v34 = vmul.f32 0.25, %v248_v30  ;;  %602 = vmatmul.mubr.msk.f32.vlgmr.msra.gmra.mxu0 %vm55_vm0, %v265_v32  ;;  %v267_v36 = vsel %vm259_vm3, %v253_v28, %v263_v33 }
 0x1b0   :  { %v266_v35 = vsel %vm258_vm4, %v248_v30, %v262_v34 }
 0x1b1   :  { %604 = vmatprep.mubr.msk.f32.mxu0 %vm55_vm0, %v266_v35 }
 0x1b2   :  { %605 = vmatmul.mubr.msk.f32.gmra.mxu0 %vm55_vm0, %v267_v36 }
 0x26e   :  { %v603_v38 = vpop.f32.mrf.mxu0 }
 0x270   :  { %v351_v39 = vpop.f32.mrf.mxu0 }
 0x272   :  { %v606_v40 = vpop.f32.mrf.mxu0 }
 0x273   :  { %608 = vmatpush3.msra.mxu1 %v606_v40 }
 0x274   :  { %v361_v41 = vpop.f32.mrf.mxu0  ;;  %609 = vmatprep.subr.mxu1 %v710_v37 }
 0x275   :  { %610 = vmatpush3.msra.mxu1 %v361_v41 }
 0x276   :  { %611 = vmatprep.subr.mxu1 %v710_v37 }
 0x277   :  { %612 = vmatpush3.msra.mxu1 %v603_v38 }
 0x278   :  { %613 = vmatprep.subr.mxu1 %v710_v37 }
 0x279   :  { %614 = vmatpush3.msra.mxu1 %v351_v39 }
 0x27a   :  { %616 = vmatmul.mubr.msk.f32.vlgmr.msra.gmra.mxu1 %vm55_vm0, %v791_v8 }
 0x27b   :  { %618 = vmatprep.mubr.msk.f32.mxu1 %vm711_vm5, %v710_v37 }
 0x27e   :  { %619 = vmatmul.mubr.msk.f32.gmra.mxu1 %vm55_vm0, %v42_v13 }
 0x27f   :  { %621 = vmatprep.mubr.msk.f32.mxu1 %vm711_vm5, %v710_v37 }
 0x282   :  { %622 = vmatmul.mubr.msk.f32.gmra.mxu1 %vm55_vm0, %v43_v14 }
 0x283   :  { %624 = vmatprep.mubr.msk.f32.mxu1 %vm711_vm5, %v710_v37 }
 0x286   :  { %625 = vmatmul.mubr.msk.f32.gmra.mxu1 %vm55_vm0, %v44_v15 }
 0x287   :  { %627 = vmatprep.mubr.msk.f32.mxu1 %vm711_vm5, %v710_v37 }
 0x28a   :  { %628 = vmatmul.mubr.msk.f32.gmra.mxu1 %vm55_vm0, %v45_v42 }
 0x33a   :  { %v445_v44 = vpop.f32.mrf.mxu1 }
 0x33b   :  { %v446_v45 = vadd.f32 %v525_v43, %v445_v44 }
 0x33c   :  { %v617_v46 = vpop.f32.mrf.mxu1 }
 0x33d   :  { %469 = vst.msk [vmem:[#allocation5] sm:$0xff] %vm55_vm0, %v446_v45 }
 0x33e   :  { %v450_v47 = vpop.f32.mrf.mxu1 }
 0x33f   :  { %v451_v48 = vadd.f32 %v525_v43, %v450_v47 }
 0x340   :  { %v620_v49 = vpop.f32.mrf.mxu1 }
 0x341   :  { %470 = vst.msk [vmem:[#allocation5 + $0x8] sm:$0xff] %vm55_vm0, %v451_v48 }
 0x342   :  { %v455_v50 = vpop.f32.mrf.mxu1 }
 0x343   :  { %v456_v51 = vadd.f32 %v525_v43, %v455_v50 }
 0x344   :  { %v623_v52 = vpop.f32.mrf.mxu1 }
 0x345   :  { %471 = vst.msk [vmem:[#allocation5 + $0x10] sm:$0xff] %vm55_vm0, %v456_v51 }
 0x346   :  { %v460_v53 = vpop.f32.mrf.mxu1 }
 0x347   :  { %v461_v54 = vadd.f32 %v525_v43, %v460_v53 }
 0x348   :  { %v626_v55 = vpop.f32.mrf.mxu1 }
 0x349   :  { %472 = vst.msk [vmem:[#allocation5 + $0x18] sm:$0xff] %vm55_vm0, %v461_v54 }
 0x34a   :  { %v465_v56 = vpop.f32.mrf.mxu1 }
 0x34b   :  { %672 = shalt.err (!%p669_p9)
}
 0x34c   :  { %492 = dma.vmem_to_hbm [thread:$0]  %s487_s13, 512, %s850_s6, [#allocation4], %s708_s27, %s708_s27, %s709_s28   ;;  %v466_v57 = vadd.f32 %v525_v43, %v465_v56  ;;  %v629_v58 = vpop.f32.mrf.mxu1  ;;  %vm479_vm6 = vcmask 254976  }
 0x34d   :  { %s713_s4 = smov [#allocation6]  }
 0x34e   :  { %v531_v59 = vmul.f32 -1.442695, %v466_v57  ;;  %s499_s16 = sshll.u32 %s713_s4, 4  ;;  %s500_s16 = int_to_ptr.vmem [resolvable:$true] %s499_s16 }
 0x34f   :  { %s681_s17 = scalar_lea.vmem %s500_s16, 32  ;;  %p686_p11 = scmp.lt.s32.totalorder %s500_s16, %s500_s16 }
 0x350   :  { %637 = vpow2.f32 %v531_v59  ;;  %p682_p10 = scmp.ne.s32.totalorder %s500_s16, %s681_s17  ;;  %p687_p12 = scmp.lt.s32.totalorder %s681_s17, %s681_s17 }
 0x352   :  { %p688_p13 = por %p687_p12, %p686_p11 }
 0x354   :  { %p689_p0 = pnand %p688_p13, %p682_p10 }
 0x35d   :  { %v638_v60 = vpop.eup %637 }
 0x35e   :  { %v476_v61 = vadd.f32 1.0, %v638_v60 }
 0x360   :  { %639 = vrcp.f32 %v476_v61 }
 0x36d   :  { %v640_v62 = vpop.eup %639 }
 0x36e   :  { %480 = vst.msk [vmem:[#allocation6] sm:$0x3] %vm479_vm6, %v640_v62 }
 0x36f   :  { %692 = shalt.err (!%p689_p0)
}
 0x370   :  { %502 = dma.vmem_to_hbm [thread:$0]  %s500_s16, 32, %s851_s7, [#allocation7]  }
 0x371   :  { %703 = dma.done.wait [#allocation4], 512  }
 0x372   :  { %704 = vsyncadd [#allocation4], 4294966784 }
 0x373   :  { %705 = dma.done.wait [#allocation7], 32  }
 0x374   :  { %706 = vsyncadd [#allocation7], 4294967264 }
 0x375   :  { %509 = vsyncpa [#allocation3], 1 }
 0x376   :  { %510 = vsyncpa [#allocation4], 1 }
 0x377   :  { %511 = vsyncpa [#allocation7], 1 }

</bundles_post_ra>
